<compile_context>
chip_gen: v5e
topology: v5e:2x2
jax: 0.10.0
libtpu: 0.0.40
codegen_flags: <defaults>
</compile_context>

<pallas_src>
import functools

import jax
import jax.numpy as jnp
from jax.experimental import pallas as pl
from jax.experimental.pallas import tpu as pltpu


# ----------------------------------------------------------------------------
# Forward kernel: one batch tile of  logits = x @ W + b.
# ----------------------------------------------------------------------------
def _env_classifier_fwd_kernel(x_ref, w_ref, b_ref, out_ref, *, use_mxu):
    x = x_ref[...].astype(jnp.float32)      # (TB, D)
    w = w_ref[...].astype(jnp.float32)      # (D, E)
    b = b_ref[...].astype(jnp.float32)      # (1, E)

    if use_mxu:
        # Production tiles (TB >= 128): route the contraction through the MXU.
        # K=32 is badly utilized but it is entirely off the VALU/vst/XLU
        # critical slots; the kernel stays HBM-bound (its floor).
        acc = jnp.dot(x, w, preferred_element_type=jnp.float32)
        out_ref[...] = (acc + b).astype(out_ref.dtype)
    else:
        # Tiny tiles: unrolled accumulation over D.  Working set is only the
        # (TB, E) output -- no (TB, D, E) intermediate, no XLU axis reduce.
        D = x.shape[1]
        acc = jnp.broadcast_to(b, out_ref.shape).astype(jnp.float32)
        for d in range(D):                              # static, D is small
            acc = acc + x[:, d:d + 1] * w[d:d + 1, :]
        out_ref[...] = acc.astype(out_ref.dtype)


# ----------------------------------------------------------------------------
# Wrapper: batch tiling, single pallas_call for the forward pass; the tiny
# grid-invariant regularizers are computed in plain JAX (hoisted out of the
# per-tile body).
# ----------------------------------------------------------------------------
def env_classifier_forward(x, w, b, *, batch_tile=2048):
    B, D = x.shape
    D2, E = w.shape
    assert D == D2 and b.shape == (1, E)

    # --- batch tiling -------------------------------------------------------
    B_pad = pl.cdiv(B, 8) * 8                 # sublane multiple
    TB = min(batch_tile, B_pad)
    # Give both v7x TensorCores work along the "parallel" axis when possible.
    if TB == B_pad and B_pad >= 16:
        TB = max(8, ((B_pad // 2) // 8) * 8)
    B_final = pl.cdiv(B_pad, TB) * TB
    num_tiles = B_final // TB

    x_p = x if B_final == B else jnp.pad(x, ((0, B_final - B), (0, 0)))

    # MXU whenever the tile is reasonably tall; VPU D-accumulation otherwise.
    use_mxu = TB >= 128

    logits_pad = pl.pallas_call(
        functools.partial(_env_classifier_fwd_kernel, use_mxu=use_mxu),
        out_shape=jax.ShapeDtypeStruct((B_final, E), jnp.float32),
        grid_spec=pltpu.PrefetchScalarGridSpec(
            num_scalar_prefetch=0,
            grid=(num_tiles,),
            in_specs=[
                pl.BlockSpec((TB, D), lambda i: (i, 0)),   # x batch tile
                pl.BlockSpec((D, E), lambda i: (0, 0)),    # W (resident)
                pl.BlockSpec((1, E), lambda i: (0, 0)),    # b (resident)
            ],
            # Last block dim == full array dim E (legal; no 128-lane padding,
            # no post-kernel lane slice, ~32x less HBM write traffic at E=4).
            out_specs=pl.BlockSpec((TB, E), lambda i: (i, 0)),
        ),
        compiler_params=pltpu.CompilerParams(
            dimension_semantics=("parallel",),             # megacore split
        ),
    )(x_p, w, b)

    logits = logits_pad if B_final == B else logits_pad[:B]

    # Regularizers: grid-invariant, 128 parameters total -- plain JAX (XLA
    # fuses this trivially); no reason to recompute them once per batch tile.
    l2 = jnp.sum(w * w) + jnp.sum(b * b)
    l1 = jnp.sum(jnp.abs(w)) + jnp.sum(jnp.abs(b))
    return logits, l2, l1


# ----------------------------------------------------------------------------
# Driver
# ----------------------------------------------------------------------------
if __name__ == "__main__":
    key = jax.random.PRNGKey(0)
    k_x, k_w, k_b = jax.random.split(key, 3)

    batch, pref_dim, num_envs = 8, 32, 4

    x = jax.random.normal(k_x, (batch, pref_dim), dtype=jnp.float32)
    # Deterministic parameter init (synthetic, not a checkpoint load).
    w = jax.random.normal(k_w, (pref_dim, num_envs), dtype=jnp.float32) * 0.1
    b = jax.random.normal(k_b, (1, num_envs), dtype=jnp.float32) * 0.01

    logits, l2, l1 = env_classifier_forward(x, w, b)
    jax.block_until_ready((logits, l2, l1))

    # Sanity check against plain-JAX reference.
    ref_logits = x @ w + b
    ref_l2 = jnp.sum(w * w) + jnp.sum(b * b)
    ref_l1 = jnp.sum(jnp.abs(w)) + jnp.sum(jnp.abs(b))
    assert jnp.allclose(logits, ref_logits, atol=1e-5, rtol=1e-5)
    assert jnp.allclose(l2, ref_l2, atol=1e-5, rtol=1e-5)
    assert jnp.allclose(l1, ref_l1, atol=1e-5, rtol=1e-5)

    print("KERNEL_OK")
</pallas_src>

<mosaic_0001>
module attributes {stable_mosaic.version = 11 : i64} {
  func.func @_env_classifier_fwd_kernel(%arg0: i32, %arg1: memref<8x32xf32, #tpu.memory_space<vmem>>, %arg2: memref<32x4xf32, #tpu.memory_space<vmem>>, %arg3: memref<1x4xf32, #tpu.memory_space<vmem>>, %arg4: memref<8x4xf32, #tpu.memory_space<vmem>>) attributes {dimension_semantics = [#tpu.dimension_semantics<parallel>], iteration_bounds = array<i64: 1>, scalar_prefetch = 0 : i64, scratch_operands = 0 : i64, tpu.core_type = #tpu.core_type<tc>, window_params = [{transform_indices = @transform_0, window_bounds = array<i64: 8, 32>}, {pipeline_mode = #tpu.pipeline_mode<synchronous>, transform_indices = @transform_1, window_bounds = array<i64: 32, 4>}, {pipeline_mode = #tpu.pipeline_mode<synchronous>, transform_indices = @transform_2, window_bounds = array<i64: 1, 4>}, {transform_indices = @transform_3, window_bounds = array<i64: 8, 4>}]} {
    %c0 = arith.constant 0 : index
    %c0_0 = arith.constant 0 : index
    %0 = vector.load %arg1[%c0, %c0_0] : memref<8x32xf32, #tpu.memory_space<vmem>>, vector<8x32xf32>
    %c0_1 = arith.constant 0 : index
    %c0_2 = arith.constant 0 : index
    %1 = vector.load %arg2[%c0_1, %c0_2] : memref<32x4xf32, #tpu.memory_space<vmem>>, vector<32x4xf32>
    %c0_3 = arith.constant 0 : index
    %c0_4 = arith.constant 0 : index
    %2 = vector.load %arg3[%c0_3, %c0_4] : memref<1x4xf32, #tpu.memory_space<vmem>>, vector<1x4xf32>
    %3 = vector.shape_cast %2 : vector<1x4xf32> to vector<1x4xf32>
    %4 = vector.broadcast %3 : vector<1x4xf32> to vector<8x4xf32>
    %5 = vector.extract_strided_slice %0 {offsets = [0, 0], sizes = [8, 1], strides = [1, 1]} : vector<8x32xf32> to vector<8x1xf32>
    %6 = vector.extract_strided_slice %1 {offsets = [0, 0], sizes = [1, 4], strides = [1, 1]} : vector<32x4xf32> to vector<1x4xf32>
    %7 = vector.broadcast %5 : vector<8x1xf32> to vector<8x4xf32>
    %8 = vector.broadcast %6 : vector<1x4xf32> to vector<8x4xf32>
    %9 = arith.mulf %7, %8 : vector<8x4xf32>
    %10 = arith.addf %4, %9 : vector<8x4xf32>
    %11 = vector.extract_strided_slice %0 {offsets = [0, 1], sizes = [8, 1], strides = [1, 1]} : vector<8x32xf32> to vector<8x1xf32>
    %12 = vector.extract_strided_slice %1 {offsets = [1, 0], sizes = [1, 4], strides = [1, 1]} : vector<32x4xf32> to vector<1x4xf32>
    %13 = vector.broadcast %11 : vector<8x1xf32> to vector<8x4xf32>
    %14 = vector.broadcast %12 : vector<1x4xf32> to vector<8x4xf32>
    %15 = arith.mulf %13, %14 : vector<8x4xf32>
    %16 = arith.addf %10, %15 : vector<8x4xf32>
    %17 = vector.extract_strided_slice %0 {offsets = [0, 2], sizes = [8, 1], strides = [1, 1]} : vector<8x32xf32> to vector<8x1xf32>
    %18 = vector.extract_strided_slice %1 {offsets = [2, 0], sizes = [1, 4], strides = [1, 1]} : vector<32x4xf32> to vector<1x4xf32>
    %19 = vector.broadcast %17 : vector<8x1xf32> to vector<8x4xf32>
    %20 = vector.broadcast %18 : vector<1x4xf32> to vector<8x4xf32>
    %21 = arith.mulf %19, %20 : vector<8x4xf32>
    %22 = arith.addf %16, %21 : vector<8x4xf32>
    %23 = vector.extract_strided_slice %0 {offsets = [0, 3], sizes = [8, 1], strides = [1, 1]} : vector<8x32xf32> to vector<8x1xf32>
    %24 = vector.extract_strided_slice %1 {offsets = [3, 0], sizes = [1, 4], strides = [1, 1]} : vector<32x4xf32> to vector<1x4xf32>
    %25 = vector.broadcast %23 : vector<8x1xf32> to vector<8x4xf32>
    %26 = vector.broadcast %24 : vector<1x4xf32> to vector<8x4xf32>
    %27 = arith.mulf %25, %26 : vector<8x4xf32>
    %28 = arith.addf %22, %27 : vector<8x4xf32>
    %29 = vector.extract_strided_slice %0 {offsets = [0, 4], sizes = [8, 1], strides = [1, 1]} : vector<8x32xf32> to vector<8x1xf32>
    %30 = vector.extract_strided_slice %1 {offsets = [4, 0], sizes = [1, 4], strides = [1, 1]} : vector<32x4xf32> to vector<1x4xf32>
    %31 = vector.broadcast %29 : vector<8x1xf32> to vector<8x4xf32>
    %32 = vector.broadcast %30 : vector<1x4xf32> to vector<8x4xf32>
    %33 = arith.mulf %31, %32 : vector<8x4xf32>
    %34 = arith.addf %28, %33 : vector<8x4xf32>
    %35 = vector.extract_strided_slice %0 {offsets = [0, 5], sizes = [8, 1], strides = [1, 1]} : vector<8x32xf32> to vector<8x1xf32>
    %36 = vector.extract_strided_slice %1 {offsets = [5, 0], sizes = [1, 4], strides = [1, 1]} : vector<32x4xf32> to vector<1x4xf32>
    %37 = vector.broadcast %35 : vector<8x1xf32> to vector<8x4xf32>
    %38 = vector.broadcast %36 : vector<1x4xf32> to vector<8x4xf32>
    %39 = arith.mulf %37, %38 : vector<8x4xf32>
    %40 = arith.addf %34, %39 : vector<8x4xf32>
    %41 = vector.extract_strided_slice %0 {offsets = [0, 6], sizes = [8, 1], strides = [1, 1]} : vector<8x32xf32> to vector<8x1xf32>
    %42 = vector.extract_strided_slice %1 {offsets = [6, 0], sizes = [1, 4], strides = [1, 1]} : vector<32x4xf32> to vector<1x4xf32>
    %43 = vector.broadcast %41 : vector<8x1xf32> to vector<8x4xf32>
    %44 = vector.broadcast %42 : vector<1x4xf32> to vector<8x4xf32>
    %45 = arith.mulf %43, %44 : vector<8x4xf32>
    %46 = arith.addf %40, %45 : vector<8x4xf32>
    %47 = vector.extract_strided_slice %0 {offsets = [0, 7], sizes = [8, 1], strides = [1, 1]} : vector<8x32xf32> to vector<8x1xf32>
    %48 = vector.extract_strided_slice %1 {offsets = [7, 0], sizes = [1, 4], strides = [1, 1]} : vector<32x4xf32> to vector<1x4xf32>
    %49 = vector.broadcast %47 : vector<8x1xf32> to vector<8x4xf32>
    %50 = vector.broadcast %48 : vector<1x4xf32> to vector<8x4xf32>
    %51 = arith.mulf %49, %50 : vector<8x4xf32>
    %52 = arith.addf %46, %51 : vector<8x4xf32>
    %53 = vector.extract_strided_slice %0 {offsets = [0, 8], sizes = [8, 1], strides = [1, 1]} : vector<8x32xf32> to vector<8x1xf32>
    %54 = vector.extract_strided_slice %1 {offsets = [8, 0], sizes = [1, 4], strides = [1, 1]} : vector<32x4xf32> to vector<1x4xf32>
    %55 = vector.broadcast %53 : vector<8x1xf32> to vector<8x4xf32>
    %56 = vector.broadcast %54 : vector<1x4xf32> to vector<8x4xf32>
    %57 = arith.mulf %55, %56 : vector<8x4xf32>
    %58 = arith.addf %52, %57 : vector<8x4xf32>
    %59 = vector.extract_strided_slice %0 {offsets = [0, 9], sizes = [8, 1], strides = [1, 1]} : vector<8x32xf32> to vector<8x1xf32>
    %60 = vector.extract_strided_slice %1 {offsets = [9, 0], sizes = [1, 4], strides = [1, 1]} : vector<32x4xf32> to vector<1x4xf32>
    %61 = vector.broadcast %59 : vector<8x1xf32> to vector<8x4xf32>
    %62 = vector.broadcast %60 : vector<1x4xf32> to vector<8x4xf32>
    %63 = arith.mulf %61, %62 : vector<8x4xf32>
    %64 = arith.addf %58, %63 : vector<8x4xf32>
    %65 = vector.extract_strided_slice %0 {offsets = [0, 10], sizes = [8, 1], strides = [1, 1]} : vector<8x32xf32> to vector<8x1xf32>
    %66 = vector.extract_strided_slice %1 {offsets = [10, 0], sizes = [1, 4], strides = [1, 1]} : vector<32x4xf32> to vector<1x4xf32>
    %67 = vector.broadcast %65 : vector<8x1xf32> to vector<8x4xf32>
    %68 = vector.broadcast %66 : vector<1x4xf32> to vector<8x4xf32>
    %69 = arith.mulf %67, %68 : vector<8x4xf32>
    %70 = arith.addf %64, %69 : vector<8x4xf32>
    %71 = vector.extract_strided_slice %0 {offsets = [0, 11], sizes = [8, 1], strides = [1, 1]} : vector<8x32xf32> to vector<8x1xf32>
    %72 = vector.extract_strided_slice %1 {offsets = [11, 0], sizes = [1, 4], strides = [1, 1]} : vector<32x4xf32> to vector<1x4xf32>
    %73 = vector.broadcast %71 : vector<8x1xf32> to vector<8x4xf32>
    %74 = vector.broadcast %72 : vector<1x4xf32> to vector<8x4xf32>
    %75 = arith.mulf %73, %74 : vector<8x4xf32>
    %76 = arith.addf %70, %75 : vector<8x4xf32>
    %77 = vector.extract_strided_slice %0 {offsets = [0, 12], sizes = [8, 1], strides = [1, 1]} : vector<8x32xf32> to vector<8x1xf32>
    %78 = vector.extract_strided_slice %1 {offsets = [12, 0], sizes = [1, 4], strides = [1, 1]} : vector<32x4xf32> to vector<1x4xf32>
    %79 = vector.broadcast %77 : vector<8x1xf32> to vector<8x4xf32>
    %80 = vector.broadcast %78 : vector<1x4xf32> to vector<8x4xf32>
    %81 = arith.mulf %79, %80 : vector<8x4xf32>
    %82 = arith.addf %76, %81 : vector<8x4xf32>
    %83 = vector.extract_strided_slice %0 {offsets = [0, 13], sizes = [8, 1], strides = [1, 1]} : vector<8x32xf32> to vector<8x1xf32>
    %84 = vector.extract_strided_slice %1 {offsets = [13, 0], sizes = [1, 4], strides = [1, 1]} : vector<32x4xf32> to vector<1x4xf32>
    %85 = vector.broadcast %83 : vector<8x1xf32> to vector<8x4xf32>
    %86 = vector.broadcast %84 : vector<1x4xf32> to vector<8x4xf32>
    %87 = arith.mulf %85, %86 : vector<8x4xf32>
    %88 = arith.addf %82, %87 : vector<8x4xf32>
    %89 = vector.extract_strided_slice %0 {offsets = [0, 14], sizes = [8, 1], strides = [1, 1]} : vector<8x32xf32> to vector<8x1xf32>
    %90 = vector.extract_strided_slice %1 {offsets = [14, 0], sizes = [1, 4], strides = [1, 1]} : vector<32x4xf32> to vector<1x4xf32>
    %91 = vector.broadcast %89 : vector<8x1xf32> to vector<8x4xf32>
    %92 = vector.broadcast %90 : vector<1x4xf32> to vector<8x4xf32>
    %93 = arith.mulf %91, %92 : vector<8x4xf32>
    %94 = arith.addf %88, %93 : vector<8x4xf32>
    %95 = vector.extract_strided_slice %0 {offsets = [0, 15], sizes = [8, 1], strides = [1, 1]} : vector<8x32xf32> to vector<8x1xf32>
    %96 = vector.extract_strided_slice %1 {offsets = [15, 0], sizes = [1, 4], strides = [1, 1]} : vector<32x4xf32> to vector<1x4xf32>
    %97 = vector.broadcast %95 : vector<8x1xf32> to vector<8x4xf32>
    %98 = vector.broadcast %96 : vector<1x4xf32> to vector<8x4xf32>
    %99 = arith.mulf %97, %98 : vector<8x4xf32>
    %100 = arith.addf %94, %99 : vector<8x4xf32>
    %101 = vector.extract_strided_slice %0 {offsets = [0, 16], sizes = [8, 1], strides = [1, 1]} : vector<8x32xf32> to vector<8x1xf32>
    %102 = vector.extract_strided_slice %1 {offsets = [16, 0], sizes = [1, 4], strides = [1, 1]} : vector<32x4xf32> to vector<1x4xf32>
    %103 = vector.broadcast %101 : vector<8x1xf32> to vector<8x4xf32>
    %104 = vector.broadcast %102 : vector<1x4xf32> to vector<8x4xf32>
    %105 = arith.mulf %103, %104 : vector<8x4xf32>
    %106 = arith.addf %100, %105 : vector<8x4xf32>
    %107 = vector.extract_strided_slice %0 {offsets = [0, 17], sizes = [8, 1], strides = [1, 1]} : vector<8x32xf32> to vector<8x1xf32>
    %108 = vector.extract_strided_slice %1 {offsets = [17, 0], sizes = [1, 4], strides = [1, 1]} : vector<32x4xf32> to vector<1x4xf32>
    %109 = vector.broadcast %107 : vector<8x1xf32> to vector<8x4xf32>
    %110 = vector.broadcast %108 : vector<1x4xf32> to vector<8x4xf32>
    %111 = arith.mulf %109, %110 : vector<8x4xf32>
    %112 = arith.addf %106, %111 : vector<8x4xf32>
    %113 = vector.extract_strided_slice %0 {offsets = [0, 18], sizes = [8, 1], strides = [1, 1]} : vector<8x32xf32> to vector<8x1xf32>
    %114 = vector.extract_strided_slice %1 {offsets = [18, 0], sizes = [1, 4], strides = [1, 1]} : vector<32x4xf32> to vector<1x4xf32>
    %115 = vector.broadcast %113 : vector<8x1xf32> to vector<8x4xf32>
    %116 = vector.broadcast %114 : vector<1x4xf32> to vector<8x4xf32>
    %117 = arith.mulf %115, %116 : vector<8x4xf32>
    %118 = arith.addf %112, %117 : vector<8x4xf32>
    %119 = vector.extract_strided_slice %0 {offsets = [0, 19], sizes = [8, 1], strides = [1, 1]} : vector<8x32xf32> to vector<8x1xf32>
    %120 = vector.extract_strided_slice %1 {offsets = [19, 0], sizes = [1, 4], strides = [1, 1]} : vector<32x4xf32> to vector<1x4xf32>
    %121 = vector.broadcast %119 : vector<8x1xf32> to vector<8x4xf32>
    %122 = vector.broadcast %120 : vector<1x4xf32> to vector<8x4xf32>
    %123 = arith.mulf %121, %122 : vector<8x4xf32>
    %124 = arith.addf %118, %123 : vector<8x4xf32>
    %125 = vector.extract_strided_slice %0 {offsets = [0, 20], sizes = [8, 1], strides = [1, 1]} : vector<8x32xf32> to vector<8x1xf32>
    %126 = vector.extract_strided_slice %1 {offsets = [20, 0], sizes = [1, 4], strides = [1, 1]} : vector<32x4xf32> to vector<1x4xf32>
    %127 = vector.broadcast %125 : vector<8x1xf32> to vector<8x4xf32>
    %128 = vector.broadcast %126 : vector<1x4xf32> to vector<8x4xf32>
    %129 = arith.mulf %127, %128 : vector<8x4xf32>
    %130 = arith.addf %124, %129 : vector<8x4xf32>
    %131 = vector.extract_strided_slice %0 {offsets = [0, 21], sizes = [8, 1], strides = [1, 1]} : vector<8x32xf32> to vector<8x1xf32>
    %132 = vector.extract_strided_slice %1 {offsets = [21, 0], sizes = [1, 4], strides = [1, 1]} : vector<32x4xf32> to vector<1x4xf32>
    %133 = vector.broadcast %131 : vector<8x1xf32> to vector<8x4xf32>
    %134 = vector.broadcast %132 : vector<1x4xf32> to vector<8x4xf32>
    %135 = arith.mulf %133, %134 : vector<8x4xf32>
    %136 = arith.addf %130, %135 : vector<8x4xf32>
    %137 = vector.extract_strided_slice %0 {offsets = [0, 22], sizes = [8, 1], strides = [1, 1]} : vector<8x32xf32> to vector<8x1xf32>
    %138 = vector.extract_strided_slice %1 {offsets = [22, 0], sizes = [1, 4], strides = [1, 1]} : vector<32x4xf32> to vector<1x4xf32>
    %139 = vector.broadcast %137 : vector<8x1xf32> to vector<8x4xf32>
    %140 = vector.broadcast %138 : vector<1x4xf32> to vector<8x4xf32>
    %141 = arith.mulf %139, %140 : vector<8x4xf32>
    %142 = arith.addf %136, %141 : vector<8x4xf32>
    %143 = vector.extract_strided_slice %0 {offsets = [0, 23], sizes = [8, 1], strides = [1, 1]} : vector<8x32xf32> to vector<8x1xf32>
    %144 = vector.extract_strided_slice %1 {offsets = [23, 0], sizes = [1, 4], strides = [1, 1]} : vector<32x4xf32> to vector<1x4xf32>
    %145 = vector.broadcast %143 : vector<8x1xf32> to vector<8x4xf32>
    %146 = vector.broadcast %144 : vector<1x4xf32> to vector<8x4xf32>
    %147 = arith.mulf %145, %146 : vector<8x4xf32>
    %148 = arith.addf %142, %147 : vector<8x4xf32>
    %149 = vector.extract_strided_slice %0 {offsets = [0, 24], sizes = [8, 1], strides = [1, 1]} : vector<8x32xf32> to vector<8x1xf32>
    %150 = vector.extract_strided_slice %1 {offsets = [24, 0], sizes = [1, 4], strides = [1, 1]} : vector<32x4xf32> to vector<1x4xf32>
    %151 = vector.broadcast %149 : vector<8x1xf32> to vector<8x4xf32>
    %152 = vector.broadcast %150 : vector<1x4xf32> to vector<8x4xf32>
    %153 = arith.mulf %151, %152 : vector<8x4xf32>
    %154 = arith.addf %148, %153 : vector<8x4xf32>
    %155 = vector.extract_strided_slice %0 {offsets = [0, 25], sizes = [8, 1], strides = [1, 1]} : vector<8x32xf32> to vector<8x1xf32>
    %156 = vector.extract_strided_slice %1 {offsets = [25, 0], sizes = [1, 4], strides = [1, 1]} : vector<32x4xf32> to vector<1x4xf32>
    %157 = vector.broadcast %155 : vector<8x1xf32> to vector<8x4xf32>
    %158 = vector.broadcast %156 : vector<1x4xf32> to vector<8x4xf32>
    %159 = arith.mulf %157, %158 : vector<8x4xf32>
    %160 = arith.addf %154, %159 : vector<8x4xf32>
    %161 = vector.extract_strided_slice %0 {offsets = [0, 26], sizes = [8, 1], strides = [1, 1]} : vector<8x32xf32> to vector<8x1xf32>
    %162 = vector.extract_strided_slice %1 {offsets = [26, 0], sizes = [1, 4], strides = [1, 1]} : vector<32x4xf32> to vector<1x4xf32>
    %163 = vector.broadcast %161 : vector<8x1xf32> to vector<8x4xf32>
    %164 = vector.broadcast %162 : vector<1x4xf32> to vector<8x4xf32>
    %165 = arith.mulf %163, %164 : vector<8x4xf32>
    %166 = arith.addf %160, %165 : vector<8x4xf32>
    %167 = vector.extract_strided_slice %0 {offsets = [0, 27], sizes = [8, 1], strides = [1, 1]} : vector<8x32xf32> to vector<8x1xf32>
    %168 = vector.extract_strided_slice %1 {offsets = [27, 0], sizes = [1, 4], strides = [1, 1]} : vector<32x4xf32> to vector<1x4xf32>
    %169 = vector.broadcast %167 : vector<8x1xf32> to vector<8x4xf32>
    %170 = vector.broadcast %168 : vector<1x4xf32> to vector<8x4xf32>
    %171 = arith.mulf %169, %170 : vector<8x4xf32>
    %172 = arith.addf %166, %171 : vector<8x4xf32>
    %173 = vector.extract_strided_slice %0 {offsets = [0, 28], sizes = [8, 1], strides = [1, 1]} : vector<8x32xf32> to vector<8x1xf32>
    %174 = vector.extract_strided_slice %1 {offsets = [28, 0], sizes = [1, 4], strides = [1, 1]} : vector<32x4xf32> to vector<1x4xf32>
    %175 = vector.broadcast %173 : vector<8x1xf32> to vector<8x4xf32>
    %176 = vector.broadcast %174 : vector<1x4xf32> to vector<8x4xf32>
    %177 = arith.mulf %175, %176 : vector<8x4xf32>
    %178 = arith.addf %172, %177 : vector<8x4xf32>
    %179 = vector.extract_strided_slice %0 {offsets = [0, 29], sizes = [8, 1], strides = [1, 1]} : vector<8x32xf32> to vector<8x1xf32>
    %180 = vector.extract_strided_slice %1 {offsets = [29, 0], sizes = [1, 4], strides = [1, 1]} : vector<32x4xf32> to vector<1x4xf32>
    %181 = vector.broadcast %179 : vector<8x1xf32> to vector<8x4xf32>
    %182 = vector.broadcast %180 : vector<1x4xf32> to vector<8x4xf32>
    %183 = arith.mulf %181, %182 : vector<8x4xf32>
    %184 = arith.addf %178, %183 : vector<8x4xf32>
    %185 = vector.extract_strided_slice %0 {offsets = [0, 30], sizes = [8, 1], strides = [1, 1]} : vector<8x32xf32> to vector<8x1xf32>
    %186 = vector.extract_strided_slice %1 {offsets = [30, 0], sizes = [1, 4], strides = [1, 1]} : vector<32x4xf32> to vector<1x4xf32>
    %187 = vector.broadcast %185 : vector<8x1xf32> to vector<8x4xf32>
    %188 = vector.broadcast %186 : vector<1x4xf32> to vector<8x4xf32>
    %189 = arith.mulf %187, %188 : vector<8x4xf32>
    %190 = arith.addf %184, %189 : vector<8x4xf32>
    %191 = vector.extract_strided_slice %0 {offsets = [0, 31], sizes = [8, 1], strides = [1, 1]} : vector<8x32xf32> to vector<8x1xf32>
    %192 = vector.extract_strided_slice %1 {offsets = [31, 0], sizes = [1, 4], strides = [1, 1]} : vector<32x4xf32> to vector<1x4xf32>
    %193 = vector.broadcast %191 : vector<8x1xf32> to vector<8x4xf32>
    %194 = vector.broadcast %192 : vector<1x4xf32> to vector<8x4xf32>
    %195 = arith.mulf %193, %194 : vector<8x4xf32>
    %196 = arith.addf %190, %195 : vector<8x4xf32>
    %c0_5 = arith.constant 0 : index
    %c0_6 = arith.constant 0 : index
    %197 = vector.load %arg4[%c0_5, %c0_6] : memref<8x4xf32, #tpu.memory_space<vmem>>, vector<8x4xf32>
    tpu.vector_store %arg4[%c0_5, %c0_6], %196 {strides = array<i32>} : memref<8x4xf32, #tpu.memory_space<vmem>>, vector<8x4xf32>,
    return
  }
  func.func @transform_0(%arg0: i32) -> (i32, i32) {
    %c0_i32 = arith.constant 0 : i32
    %c0_i32_0 = arith.constant 0 : i32
    return %arg0, %c0_i32 : i32, i32
  }
  func.func @transform_1(%arg0: i32) -> (i32, i32) {
    %c0_i32 = arith.constant 0 : i32
    %c0_i32_0 = arith.constant 0 : i32
    %c0_i32_1 = arith.constant 0 : i32
    return %c0_i32, %c0_i32_0 : i32, i32
  }
  func.func @transform_2(%arg0: i32) -> (i32, i32) {
    %c0_i32 = arith.constant 0 : i32
    %c0_i32_0 = arith.constant 0 : i32
    %c0_i32_1 = arith.constant 0 : i32
    return %c0_i32, %c0_i32_0 : i32, i32
  }
  func.func @transform_3(%arg0: i32) -> (i32, i32) {
    %c0_i32 = arith.constant 0 : i32
    %c0_i32_0 = arith.constant 0 : i32
    return %arg0, %c0_i32 : i32, i32
  }
}

</mosaic_0001>

<bundles_post_ra>
// kernel: tpu_custom_call.1
= control target key start
LH: loop header
LB: loop body
LE: loop exit
PB: predicated region body
PF: predicated region fallthrough
CT: control target
= control target key end

     0   :  { %v320_v0 = vmov 2   ;;  %v321_v1 = vmov 0   ;;  %v322_v3 = vmov 4   ;;  %v323_v4 = vmov 3   ;;  %s427_s0 = inlined_call_operand.vmem [shape: f32[8,32], index: 0, kind: input, shape index: {}]   ;;  %s428_s2 = inlined_call_operand.vmem [shape: f32[1,4], index: 2, kind: input, shape index: {}]   ;;  %s429_s1 = inlined_call_operand.vmem [shape: f32[32,4], index: 1, kind: input, shape index: {}]   ;;  %s430_s3 = inlined_call_operand.vmem [shape: f32[8,4], index: 3, kind: output, shape index: {}]  }
   0x1   :  { %288 = vset.pattern.permute.xlu1 %v320_v0  ;;  %286 = vset.pattern.permute.xlu0 %v321_v1  ;;  %v375_v2 = vld [vmem:[%s427_s0] sm:$0xff]  ;;  %v324_v5 = vmov 1   ;;  %v325_v6 = vmov 5   ;;  %v326_v7 = vmov 6   ;;  %v327_v8 = vmov 8  }
   0x2   :  { %39 = vperm.xlu1 %288, %v375_v2   ;;  %25 = vperm.xlu0 %286, %v375_v2   ;;  %v328_v9 = vmov 7   ;;  %v329_v10 = vmov 9   ;;  %v330_v11 = vmov 13   ;;  %v331_v12 = vmov 10   ;;  %v15_v34 = vld [vmem:[%s429_s1] sm:$0xff] }
   0x3   :  { %290 = vset.pattern.permute.xlu2 %v322_v3  ;;  %v332_v13 = vmov 11   ;;  %v333_v14 = vmov 18   ;;  %v334_v15 = vmov 12   ;;  %v335_v16 = vmov 14   ;;  %v319_v39 = vld [vmem:[%s428_s2] ss:$0 sm:$0xff] }
   0x4   :  { %53 = vperm.xlu2 %290, %v375_v2   ;;  %v336_v17 = vmov 23   ;;  %v337_v18 = vmov 15   ;;  %v338_v19 = vmov 16   ;;  %v339_v20 = vmov 17  }
   0x5   :  { %v340_v21 = vmov 28   ;;  %v341_v22 = vmov 19   ;;  %v342_v23 = vmov 20   ;;  %v343_v24 = vmov 31  }
   0x6   :  { %v344_v25 = vmov 21   ;;  %v345_v26 = vmov 22   ;;  %v346_v27 = vmov 24   ;;  %v347_v28 = vmov 25  }
   0x7   :  { %v348_v29 = vmov 26   ;;  %v349_v30 = vmov 27   ;;  %v350_v31 = vmov 29   ;;  %v351_v32 = vmov 30  }
   0x8   :  { %v28_v36 = vperm.slane %v15_v34, 0  ;;  %v35_v41 = vperm.slane %v15_v34, 1  ;;  %v42_v43 = vperm.slane %v15_v34, 2  ;;  %v49_v50 = vperm.slane %v15_v34, 3 }
   0x9   :  { %v56_v52 = vperm.slane %v15_v34, 4  ;;  %v63_v55 = vperm.slane %v15_v34, 5  ;;  %v70_v61 = vperm.slane %v15_v34, 6  ;;  %v77_v0 = vperm.slane %v15_v34, 7 }
   0xa   :  { %289 = vset.pattern.permute.xlu1 %v323_v4  ;;  %287 = vset.pattern.permute.xlu0 %v324_v5  ;;  %vm248_vm0 = vcmask 31744  }
   0xb   :  { %46 = vperm.xlu1 %289, %v375_v2   ;;  %32 = vperm.xlu0 %287, %v375_v2  }
   0xc   :  { %291 = vset.pattern.permute.xlu2 %v325_v6 }
   0xd   :  { %60 = vperm.xlu2 %291, %v375_v2  }
  0x13   :  { %292 = vset.pattern.permute.xlu1 %v326_v7  ;;  %294 = vset.pattern.permute.xlu0 %v327_v8 }
  0x14   :  { %67 = vperm.xlu1 %292, %v375_v2   ;;  %81 = vperm.xlu0 %294, %v375_v2  }
  0x15   :  { %293 = vset.pattern.permute.xlu2 %v328_v9 }
  0x16   :  { %74 = vperm.xlu2 %293, %v375_v2  }
  0x1c   :  { %295 = vset.pattern.permute.xlu1 %v329_v10  ;;  %299 = vset.pattern.permute.xlu0 %v330_v11 }
  0x1d   :  { %88 = vperm.xlu1 %295, %v375_v2   ;;  %116 = vperm.xlu0 %299, %v375_v2  }
  0x1e   :  { %296 = vset.pattern.permute.xlu2 %v331_v12 }
  0x1f   :  { %95 = vperm.xlu2 %296, %v375_v2  }
  0x25   :  { %297 = vset.pattern.permute.xlu1 %v332_v13  ;;  %304 = vset.pattern.permute.xlu0 %v333_v14 }
  0x26   :  { %102 = vperm.xlu1 %297, %v375_v2   ;;  %151 = vperm.xlu0 %304, %v375_v2  }
  0x27   :  { %298 = vset.pattern.permute.xlu2 %v334_v15 }
  0x28   :  { %109 = vperm.xlu2 %298, %v375_v2  }
  0x2e   :  { %300 = vset.pattern.permute.xlu1 %v335_v16  ;;  %309 = vset.pattern.permute.xlu0 %v336_v17 }
  0x2f   :  { %123 = vperm.xlu1 %300, %v375_v2   ;;  %186 = vperm.xlu0 %309, %v375_v2  }
  0x30   :  { %301 = vset.pattern.permute.xlu2 %v337_v18 }
  0x31   :  { %130 = vperm.xlu2 %301, %v375_v2  }
  0x37   :  { %302 = vset.pattern.permute.xlu1 %v338_v19  ;;  %314 = vset.pattern.permute.xlu0 %v340_v21 }
  0x38   :  { %137 = vperm.xlu1 %302, %v375_v2   ;;  %221 = vperm.xlu0 %314, %v375_v2  }
  0x39   :  { %303 = vset.pattern.permute.xlu2 %v339_v20 }
  0x3a   :  { %144 = vperm.xlu2 %303, %v375_v2  }
  0x40   :  { %305 = vset.pattern.permute.xlu1 %v341_v22  ;;  %318 = vset.pattern.permute.xlu0 %v343_v24 }
  0x41   :  { %158 = vperm.xlu1 %305, %v375_v2  }
  0x42   :  { %306 = vset.pattern.permute.xlu2 %v342_v23 }
  0x43   :  { %165 = vperm.xlu2 %306, %v375_v2  }
  0x49   :  { %307 = vset.pattern.permute.xlu1 %v344_v25 }
  0x4a   :  { %172 = vperm.xlu1 %307, %v375_v2  }
  0x4b   :  { %308 = vset.pattern.permute.xlu2 %v345_v26 }
  0x4c   :  { %179 = vperm.xlu2 %308, %v375_v2  }
  0x52   :  { %310 = vset.pattern.permute.xlu1 %v346_v27 }
  0x53   :  { %193 = vperm.xlu1 %310, %v375_v2  }
  0x54   :  { %311 = vset.pattern.permute.xlu2 %v347_v28 }
  0x55   :  { %200 = vperm.xlu2 %311, %v375_v2  }
  0x5b   :  { %312 = vset.pattern.permute.xlu1 %v348_v29 }
  0x5c   :  { %207 = vperm.xlu1 %312, %v375_v2  }
  0x5d   :  { %313 = vset.pattern.permute.xlu2 %v349_v30  ;;  %v17_v30 = vld [vmem:[%s429_s1 + $0x10] sm:$0xff] }
  0x5e   :  { %214 = vperm.xlu2 %313, %v375_v2   ;;  %v54_v33 = vpop.permute.xlu2 %53 }
  0x5f   :  { %v57_v57 = vmul.f32 %v56_v52, %v54_v33  ;;  %v168_v52 = vperm.slane %v17_v30, 4 }
  0x64   :  { %315 = vset.pattern.permute.xlu1 %v350_v31 }
  0x65   :  { %228 = vperm.xlu1 %315, %v375_v2  }
  0x66   :  { %316 = vset.pattern.permute.xlu2 %v351_v32 }
  0x67   :  { %235 = vperm.xlu2 %316, %v375_v2   ;;  %v61_v38 = vpop.permute.xlu2 %60 }
  0x68   :  { %v64_v60 = vmul.f32 %v63_v55, %v61_v38 }
  0x6d   :  { %317 = vset.pattern.permute.xlu1 %v343_v24 }
  0x6e   :  { %242 = vperm.xlu1 %317, %v375_v2   ;;  %v16_v2 = vld [vmem:[%s429_s1 + $0x8] sm:$0xff] }
  0x6f   :  { %v84_v5 = vperm.slane %v16_v2, 0  ;;  %v91_v8 = vperm.slane %v16_v2, 1  ;;  %v98_v13 = vperm.slane %v16_v2, 2  ;;  %v105_v15 = vperm.slane %v16_v2, 3 }
  0x70   :  { %v75_v48 = vpop.permute.xlu2 %74  ;;  %v112_v20 = vperm.slane %v16_v2, 4  ;;  %v119_v25 = vperm.slane %v16_v2, 5  ;;  %v126_v27 = vperm.slane %v16_v2, 6  ;;  %v133_v33 = vperm.slane %v16_v2, 7 }
  0x71   :  { %v78_v4 = vmul.f32 %v77_v0, %v75_v48  ;;  %v161_v48 = vperm.slane %v17_v30, 3 }
  0x74   :  { %v40_v35 = vpop.permute.xlu1 %39  ;;  %v26_v37 = vpop.permute.xlu0 %25 }
  0x75   :  { %v29_v40 = vmul.f32 %v28_v36, %v26_v37  ;;  %v43_v49 = vmul.f32 %v42_v43, %v40_v35  ;;  %v140_v36 = vperm.slane %v17_v30, 0 }
  0x77   :  { %v30_v42 = vadd.f32 %v319_v39, %v29_v40  ;;  %v147_v40 = vperm.slane %v17_v30, 1 }
  0x79   :  { %v96_v58 = vpop.permute.xlu2 %95 }
  0x7a   :  { %v99_v17 = vmul.f32 %v98_v13, %v96_v58 }
  0x7d   :  { %v47_v44 = vpop.permute.xlu1 %46  ;;  %v33_v45 = vpop.permute.xlu0 %32 }
  0x7e   :  { %v36_v46 = vmul.f32 %v35_v41, %v33_v45  ;;  %v50_v53 = vmul.f32 %v49_v50, %v47_v44  ;;  %v154_v45 = vperm.slane %v17_v30, 2 }
  0x80   :  { %v37_v47 = vadd.f32 %v36_v46, %v30_v42 }
  0x82   :  { %v44_v51 = vadd.f32 %v43_v49, %v37_v47  ;;  %v110_v7 = vpop.permute.xlu2 %109 }
  0x83   :  { %v113_v24 = vmul.f32 %v112_v20, %v110_v7 }
  0x84   :  { %v51_v56 = vadd.f32 %v50_v53, %v44_v51 }
  0x86   :  { %v68_v54 = vpop.permute.xlu1 %67  ;;  %v58_v59 = vadd.f32 %v57_v57, %v51_v56  ;;  %v82_v6 = vpop.permute.xlu0 %81 }
  0x87   :  { %v71_v63 = vmul.f32 %v70_v61, %v68_v54  ;;  %v85_v10 = vmul.f32 %v84_v5, %v82_v6  ;;  %v175_v54 = vperm.slane %v17_v30, 5 }
  0x88   :  { %v65_v62 = vadd.f32 %v64_v60, %v58_v59  ;;  %v182_v60 = vperm.slane %v17_v30, 6 }
  0x8a   :  { %v72_v3 = vadd.f32 %v71_v63, %v65_v62  ;;  %v18_v62 = vld [vmem:[%s429_s1 + $0x18] sm:$0xff] }
  0x8b   :  { %v131_v18 = vpop.permute.xlu2 %130 }
  0x8c   :  { %v79_v9 = vadd.f32 %v78_v4, %v72_v3  ;;  %v134_v38 = vmul.f32 %v133_v33, %v131_v18  ;;  %v196_v3 = vperm.slane %v18_v62, 0  ;;  %v245_v33 = vperm.slane %v18_v62, 7 }
  0x8e   :  { %v86_v14 = vadd.f32 %v85_v10, %v79_v9  ;;  %v203_v9 = vperm.slane %v18_v62, 1 }
  0x8f   :  { %v89_v1 = vpop.permute.xlu1 %88  ;;  %v117_v26 = vpop.permute.xlu0 %116 }
  0x90   :  { %v92_v12 = vmul.f32 %v91_v8, %v89_v1  ;;  %v120_v29 = vmul.f32 %v119_v25, %v117_v26  ;;  %v189_v1 = vperm.slane %v17_v30, 7 }
  0x92   :  { %v93_v16 = vadd.f32 %v92_v12, %v86_v14 }
  0x94   :  { %v100_v21 = vadd.f32 %v99_v17, %v93_v16  ;;  %v145_v31 = vpop.permute.xlu2 %144  ;;  %v217_v16 = vperm.slane %v18_v62, 3 }
  0x95   :  { %v148_v44 = vmul.f32 %v147_v40, %v145_v31 }
  0x98   :  { %v103_v11 = vpop.permute.xlu1 %102  ;;  %v152_v47 = vpop.permute.xlu0 %151 }
  0x99   :  { %v106_v19 = vmul.f32 %v105_v15, %v103_v11  ;;  %v155_v50 = vmul.f32 %v154_v45, %v152_v47  ;;  %v210_v11 = vperm.slane %v18_v62, 2 }
  0x9b   :  { %v107_v23 = vadd.f32 %v106_v19, %v100_v21  ;;  %v224_v21 = vperm.slane %v18_v62, 4 }
  0x9d   :  { %v114_v28 = vadd.f32 %v113_v24, %v107_v23  ;;  %v166_v42 = vpop.permute.xlu2 %165  ;;  %v231_v23 = vperm.slane %v18_v62, 5 }
  0x9e   :  { %v169_v58 = vmul.f32 %v168_v52, %v166_v42 }
  0x9f   :  { %v121_v35 = vadd.f32 %v120_v29, %v114_v28  ;;  %v238_v28 = vperm.slane %v18_v62, 6 }
  0xa1   :  { %v124_v22 = vpop.permute.xlu1 %123  ;;  %v187_v2 = vpop.permute.xlu0 %186 }
  0xa2   :  { %v127_v32 = vmul.f32 %v126_v27, %v124_v22  ;;  %v190_v7 = vmul.f32 %v189_v1, %v187_v2 }
  0xa4   :  { %v128_v37 = vadd.f32 %v127_v32, %v121_v35 }
  0xa6   :  { %v135_v41 = vadd.f32 %v134_v38, %v128_v37  ;;  %v180_v56 = vpop.permute.xlu2 %179 }
  0xa7   :  { %v183_v0 = vmul.f32 %v182_v60, %v180_v56 }
  0xaa   :  { %v138_v34 = vpop.permute.xlu1 %137  ;;  %v222_v22 = vpop.permute.xlu0 %221 }
  0xab   :  { %v141_v39 = vmul.f32 %v140_v36, %v138_v34  ;;  %v225_v25 = vmul.f32 %v224_v21, %v222_v22 }
  0xad   :  { %v142_v43 = vadd.f32 %v141_v39, %v135_v41 }
  0xaf   :  { %v149_v49 = vadd.f32 %v148_v44, %v142_v43  ;;  %v201_v5 = vpop.permute.xlu2 %200 }
  0xb0   :  { %v204_v13 = vmul.f32 %v203_v9, %v201_v5 }
  0xb1   :  { %v156_v53 = vadd.f32 %v155_v50, %v149_v49 }
  0xb3   :  { %v159_v46 = vpop.permute.xlu1 %158 }
  0xb4   :  { %v162_v51 = vmul.f32 %v161_v48, %v159_v46 }
  0xb6   :  { %v163_v57 = vadd.f32 %v162_v51, %v156_v53 }
  0xb8   :  { %v170_v61 = vadd.f32 %v169_v58, %v163_v57  ;;  %v215_v17 = vpop.permute.xlu2 %214 }
  0xb9   :  { %v218_v20 = vmul.f32 %v217_v16, %v215_v17 }
  0xbc   :  { %v173_v55 = vpop.permute.xlu1 %172 }
  0xbd   :  { %v176_v59 = vmul.f32 %v175_v54, %v173_v55 }
  0xbf   :  { %v177_v63 = vadd.f32 %v176_v59, %v170_v61 }
  0xc1   :  { %v184_v6 = vadd.f32 %v183_v0, %v177_v63  ;;  %v236_v29 = vpop.permute.xlu2 %235 }
  0xc2   :  { %v239_v32 = vmul.f32 %v238_v28, %v236_v29 }
  0xc3   :  { %v191_v10 = vadd.f32 %v190_v7, %v184_v6 }
  0xc5   :  { %v194_v4 = vpop.permute.xlu1 %193 }
  0xc6   :  { %v197_v8 = vmul.f32 %v196_v3, %v194_v4 }
  0xc8   :  { %v198_v12 = vadd.f32 %v197_v8, %v191_v10 }
  0xca   :  { %v205_v18 = vadd.f32 %v204_v13, %v198_v12 }
  0xce   :  { %v208_v14 = vpop.permute.xlu1 %207 }
  0xcf   :  { %v211_v15 = vmul.f32 %v210_v11, %v208_v14 }
  0xd1   :  { %v212_v19 = vadd.f32 %v211_v15, %v205_v18 }
  0xd3   :  { %v219_v24 = vadd.f32 %v218_v20, %v212_v19 }
  0xd5   :  { %v226_v30 = vadd.f32 %v225_v25, %v219_v24 }
  0xd7   :  { %v229_v26 = vpop.permute.xlu1 %228 }
  0xd8   :  { %v232_v27 = vmul.f32 %v231_v23, %v229_v26 }
  0xda   :  { %v233_v31 = vadd.f32 %v232_v27, %v226_v30 }
  0xdc   :  { %v240_v35 = vadd.f32 %v239_v32, %v233_v31 }
  0xe0   :  { %v243_v34 = vpop.permute.xlu1 %242 }
  0xe1   :  { %v246_v36 = vmul.f32 %v245_v33, %v243_v34 }
  0xe3   :  { %v247_v37 = vadd.f32 %v246_v36, %v240_v35 }
  0xe5   :  { %249 = vst.msk [vmem:[%s430_s3] sm:$0xff] %vm248_vm0, %v247_v37 }

</bundles_post_ra>
